<compile_context>
chip_gen: v7x
topology: tpu7x:2x2x1
jax: 0.10.0
libtpu: 0.0.40
codegen_flags: <defaults>
</compile_context>

<pallas_src>
import jax
import jax.numpy as jnp
from jax.experimental import pallas as pl
from jax.experimental.pallas import tpu as pltpu

# Model dims implied by the PyTorch module (kept small for the demo).
INPUT_SIZE = 32
HIDDEN_SIZE = 64
OUTPUT_SIZE = 8
BATCH = 8

MAX_TILE_B = 512   # large tiles amortize ~0.35us/grid-step; still <2 MiB VMEM


def _round_up(n, m):
    return ((n + m - 1) // m) * m


def _pick_tile_b(batch):
    # Multiple of 8 (f32 sublane), capped, and sized so large batches give
    # >= 2 grid steps (lets v7x shard the "parallel" axis across both TCs).
    tile = min(MAX_TILE_B, _round_up(pl.cdiv(batch, 2), 8))
    return max(tile, 8)


def mlp_kernel(x_ref, w1_ref, b1_ref, w2_ref, b2_ref, o_ref):
    # x_ref : (TILE_B, IN)  f32   -> cast to bf16 for the MXU in-register
    # w1_ref: (IN, HID)     bf16     b1_ref: (1, HID) f32
    # w2_ref: (HID, OUT)    bf16     b2_ref: (1, OUT) f32
    # o_ref : (TILE_B, OUT) f32
    x = x_ref[...].astype(jnp.bfloat16)
    h = jnp.dot(x, w1_ref[...], preferred_element_type=jnp.float32)
    h = jnp.maximum(h + b1_ref[...], 0.0)                     # bias + relu in f32
    y = jnp.dot(h.astype(jnp.bfloat16), w2_ref[...],
                preferred_element_type=jnp.float32)
    o_ref[...] = y + b2_ref[...]


def prepare_params(w1, b1, w2, b2):
    """One-time parameter prep (do NOT call per forward step).

    Weights are stored [in, out] (transpose of torch's [out, in]) and cast to
    bf16 for the MXU; biases become (1, d) f32 rows.
    """
    return (w1.astype(jnp.bfloat16),
            b1.reshape(1, -1).astype(jnp.float32),
            w2.astype(jnp.bfloat16),
            b2.reshape(1, -1).astype(jnp.float32))


def mlp_forward(x, w1_bf16, b1_row, w2_bf16, b2_row):
    """x: (B, in) f32; params from prepare_params().
    Computes relu(x @ w1 + b1) @ w2 + b2 (same semantics as the PyTorch MLP)."""
    B, in_dim = x.shape
    hid = w1_bf16.shape[1]
    out_dim = w2_bf16.shape[1]

    tile_b = _pick_tile_b(B)
    grid = (pl.cdiv(B, tile_b),)   # un-padded batch; last block is masked

    cost = pl.CostEstimate(
        flops=2 * B * (in_dim * hid + hid * out_dim),
        transcendentals=0,
        bytes_accessed=(B * in_dim * 4            # x (f32)
                        + in_dim * hid * 2        # w1 (bf16)
                        + hid * 4                 # b1
                        + hid * out_dim * 2       # w2 (bf16)
                        + out_dim * 4             # b2
                        + B * out_dim * 4))       # out (f32)

    return pl.pallas_call(
        mlp_kernel,
        out_shape=jax.ShapeDtypeStruct((B, out_dim), jnp.float32),
        grid_spec=pl.GridSpec(
            grid=grid,
            in_specs=[
                pl.BlockSpec((tile_b, in_dim), lambda i: (i, 0)),
                pl.BlockSpec((in_dim, hid), lambda i: (0, 0)),    # resident
                pl.BlockSpec((1, hid), lambda i: (0, 0)),         # resident
                pl.BlockSpec((hid, out_dim), lambda i: (0, 0)),   # resident
                pl.BlockSpec((1, out_dim), lambda i: (0, 0)),     # resident
            ],
            out_specs=pl.BlockSpec((tile_b, out_dim), lambda i: (i, 0)),
        ),
        compiler_params=pltpu.CompilerParams(
            dimension_semantics=("parallel",)),
        cost_estimate=cost,
    )(x, w1_bf16, b1_row, w2_bf16, b2_row)


def init_params(key):
    # Mimic PyTorch nn.Linear default init: U(-1/sqrt(fan_in), 1/sqrt(fan_in)).
    k1, k2, k3, k4 = jax.random.split(key, 4)
    bound1 = 1.0 / jnp.sqrt(INPUT_SIZE)
    bound2 = 1.0 / jnp.sqrt(HIDDEN_SIZE)
    w1 = jax.random.uniform(k1, (INPUT_SIZE, HIDDEN_SIZE), jnp.float32,
                            -bound1, bound1)
    b1 = jax.random.uniform(k2, (HIDDEN_SIZE,), jnp.float32, -bound1, bound1)
    w2 = jax.random.uniform(k3, (HIDDEN_SIZE, OUTPUT_SIZE), jnp.float32,
                            -bound2, bound2)
    b2 = jax.random.uniform(k4, (OUTPUT_SIZE,), jnp.float32, -bound2, bound2)
    return w1, b1, w2, b2


if __name__ == "__main__":
    key = jax.random.PRNGKey(0)
    kx, kp = jax.random.split(key)
    x = jax.random.normal(kx, (BATCH, INPUT_SIZE), jnp.float32)
    w1, b1, w2, b2 = init_params(kp)

    params = prepare_params(w1, b1, w2, b2)   # one-time prep, outside forward
    out = mlp_forward(x, *params)
    out = jax.block_until_ready(out)
    assert out.shape == (BATCH, OUTPUT_SIZE)

    # Reference with the same bf16 quantization (f32 accumulation) so the
    # check stays tight.
    xq = x.astype(jnp.bfloat16).astype(jnp.float32)
    w1q = w1.astype(jnp.bfloat16).astype(jnp.float32)
    w2q = w2.astype(jnp.bfloat16).astype(jnp.float32)
    h_ref = jnp.maximum(xq @ w1q + b1[None, :], 0.0)
    ref = h_ref.astype(jnp.bfloat16).astype(jnp.float32) @ w2q + b2[None, :]
    assert jnp.allclose(out, ref, atol=1e-3, rtol=1e-3), (
        float(jnp.max(jnp.abs(out - ref))))

    # Loose sanity check against the full-precision reference too.
    ref_f32 = jnp.maximum(x @ w1 + b1[None, :], 0.0) @ w2 + b2[None, :]
    assert jnp.allclose(out, ref_f32, atol=5e-2, rtol=5e-2)

    print("KERNEL_OK")
</pallas_src>

<mosaic_0001>
module attributes {stable_mosaic.version = 11 : i64} {
  func.func @mlp_kernel(%arg0: i32, %arg1: memref<8x32xf32, #tpu.memory_space<vmem>>, %arg2: memref<32x64xbf16, #tpu.memory_space<vmem>>, %arg3: memref<1x64xf32, #tpu.memory_space<vmem>>, %arg4: memref<64x8xbf16, #tpu.memory_space<vmem>>, %arg5: memref<1x8xf32, #tpu.memory_space<vmem>>, %arg6: memref<8x8xf32, #tpu.memory_space<vmem>>) attributes {dimension_semantics = [#tpu.dimension_semantics<parallel>], iteration_bounds = array<i64: 1>, scalar_prefetch = 0 : i64, scratch_operands = 0 : i64, tpu.core_type = #tpu.core_type<tc>, window_params = [{transform_indices = @transform_0, window_bounds = array<i64: 8, 32>}, {pipeline_mode = #tpu.pipeline_mode<synchronous>, transform_indices = @transform_1, window_bounds = array<i64: 32, 64>}, {pipeline_mode = #tpu.pipeline_mode<synchronous>, transform_indices = @transform_2, window_bounds = array<i64: 1, 64>}, {pipeline_mode = #tpu.pipeline_mode<synchronous>, transform_indices = @transform_3, window_bounds = array<i64: 64, 8>}, {pipeline_mode = #tpu.pipeline_mode<synchronous>, transform_indices = @transform_4, window_bounds = array<i64: 1, 8>}, {transform_indices = @transform_5, window_bounds = array<i64: 8, 8>}]} {
    %c0 = arith.constant 0 : index
    %c0_0 = arith.constant 0 : index
    %0 = vector.load %arg1[%c0, %c0_0] : memref<8x32xf32, #tpu.memory_space<vmem>>, vector<8x32xf32>
    %1 = arith.truncf %0 : vector<8x32xf32> to vector<8x32xbf16>
    %c0_1 = arith.constant 0 : index
    %c0_2 = arith.constant 0 : index
    %2 = vector.load %arg2[%c0_1, %c0_2] : memref<32x64xbf16, #tpu.memory_space<vmem>>, vector<32x64xbf16>
    %cst = arith.constant dense<0.000000e+00> : vector<8x64xf32>
    %3 = tpu.matmul %1, %2, %cst {dimension_numbers = #tpu.dot_dimension_numbers<[1], [0], [0], [1], [0, 0, 1, 1], [], []>} : vector<8x32xbf16>, vector<32x64xbf16>, vector<8x64xf32> -> vector<8x64xf32>
    %c0_3 = arith.constant 0 : index
    %c0_4 = arith.constant 0 : index
    %4 = vector.load %arg3[%c0_3, %c0_4] : memref<1x64xf32, #tpu.memory_space<vmem>>, vector<1x64xf32>
    %5 = vector.broadcast %4 : vector<1x64xf32> to vector<8x64xf32>
    %6 = arith.addf %3, %5 : vector<8x64xf32>
    %cst_5 = arith.constant 0.000000e+00 : f32
    %7 = vector.broadcast %cst_5 : f32 to vector<8x64xf32>
    %8 = arith.maximumf %6, %7 : vector<8x64xf32>
    %9 = arith.truncf %8 : vector<8x64xf32> to vector<8x64xbf16>
    %c0_6 = arith.constant 0 : index
    %c0_7 = arith.constant 0 : index
    %10 = vector.load %arg4[%c0_6, %c0_7] : memref<64x8xbf16, #tpu.memory_space<vmem>>, vector<64x8xbf16>
    %cst_8 = arith.constant dense<0.000000e+00> : vector<8x8xf32>
    %11 = tpu.matmul %9, %10, %cst_8 {dimension_numbers = #tpu.dot_dimension_numbers<[1], [0], [0], [1], [0, 0, 1, 1], [], []>} : vector<8x64xbf16>, vector<64x8xbf16>, vector<8x8xf32> -> vector<8x8xf32>
    %c0_9 = arith.constant 0 : index
    %c0_10 = arith.constant 0 : index
    %12 = vector.load %arg5[%c0_9, %c0_10] : memref<1x8xf32, #tpu.memory_space<vmem>>, vector<1x8xf32>
    %13 = vector.broadcast %12 : vector<1x8xf32> to vector<8x8xf32>
    %14 = arith.addf %11, %13 : vector<8x8xf32>
    %c0_11 = arith.constant 0 : index
    %c0_12 = arith.constant 0 : index
    %15 = vector.load %arg6[%c0_11, %c0_12] : memref<8x8xf32, #tpu.memory_space<vmem>>, vector<8x8xf32>
    tpu.vector_store %arg6[%c0_11, %c0_12], %14 {strides = array<i32>} : memref<8x8xf32, #tpu.memory_space<vmem>>, vector<8x8xf32>,
    return
  }
  func.func @transform_0(%arg0: i32) -> (i32, i32) {
    %c0_i32 = arith.constant 0 : i32
    %c0_i32_0 = arith.constant 0 : i32
    return %arg0, %c0_i32 : i32, i32
  }
  func.func @transform_1(%arg0: i32) -> (i32, i32) {
    %c0_i32 = arith.constant 0 : i32
    %c0_i32_0 = arith.constant 0 : i32
    %c0_i32_1 = arith.constant 0 : i32
    return %c0_i32, %c0_i32_0 : i32, i32
  }
  func.func @transform_2(%arg0: i32) -> (i32, i32) {
    %c0_i32 = arith.constant 0 : i32
    %c0_i32_0 = arith.constant 0 : i32
    %c0_i32_1 = arith.constant 0 : i32
    return %c0_i32, %c0_i32_0 : i32, i32
  }
  func.func @transform_3(%arg0: i32) -> (i32, i32) {
    %c0_i32 = arith.constant 0 : i32
    %c0_i32_0 = arith.constant 0 : i32
    %c0_i32_1 = arith.constant 0 : i32
    return %c0_i32, %c0_i32_0 : i32, i32
  }
  func.func @transform_4(%arg0: i32) -> (i32, i32) {
    %c0_i32 = arith.constant 0 : i32
    %c0_i32_0 = arith.constant 0 : i32
    %c0_i32_1 = arith.constant 0 : i32
    return %c0_i32, %c0_i32_0 : i32, i32
  }
  func.func @transform_5(%arg0: i32) -> (i32, i32) {
    %c0_i32 = arith.constant 0 : i32
    %c0_i32_0 = arith.constant 0 : i32
    return %arg0, %c0_i32 : i32, i32
  }
}

</mosaic_0001>

<bundles_post_ra>
// kernel: tpu_custom_call.1
= control target key start
LH: loop header
LB: loop body
LE: loop exit
PB: predicated region body
PF: predicated region fallthrough
CT: control target
= control target key end

     0   :  { %v263_v1 = vmov 0.0   ;;  %vm264_vm0 = vmmov 0   ;;  %vm47_vm1 = vcmask 261120   ;;  %s335_s0 = inlined_call_operand.vmem [shape: f32[8,32], index: 0, kind: input, shape index: {}]   ;;  %s336_s1 = inlined_call_operand.vmem [shape: bf16[32,64], index: 1, kind: input, shape index: {}]   ;;  %s337_s2 = inlined_call_operand.vmem [shape: f32[1,64], index: 2, kind: input, shape index: {}]   ;;  %s338_s3 = inlined_call_operand.vmem [shape: bf16[64,8], index: 3, kind: input, shape index: {}]   ;;  %s339_s4 = inlined_call_operand.vmem [shape: f32[1,8], index: 4, kind: input, shape index: {}]   ;;  %s340_s5 = inlined_call_operand.hbm [shape: f32[8,8], index: 5, kind: output, shape index: {}]  }
   0x1   :  { %v233_v0 = vld [vmem:[%s336_s1] sm:$0xff]   ;;  %210 = vmatprep.subr.bf16.mxu0 %v263_v1  ;;  %v234_v2 = vld [vmem:[%s336_s1 + $0x8] sm:$0xff]   ;;  %218 = vmatprep.subr.bf16.mxu1 %v263_v1 }
   0x2   :  { %211 = vmatpush3.bf16.msra.mxu0 %v233_v0  ;;  %214 = vmatprep.mubr.msk.bf16.mxu0 %vm264_vm0, %v263_v1  ;;  %v22_v3 = vld [vmem:[%s335_s0] sm:$0xff]  ;;  %v236_v5 = vld [vmem:[%s338_s3 + $0x8] sm:$0xff]  }
   0x3   :  { %212 = vmatprep.subr.bf16.mxu0 %v263_v1  ;;  %v235_v4 = vld [vmem:[%s338_s3] sm:$0xff]   ;;  %226 = vmatprep.mubr.msk.bf16.mxu1 %vm264_vm0, %v263_v1  ;;  %v23_v6 = vpack.c.bf16 %v22_v3, %v22_v3 }
   0x4   :  { %219 = vmatpush3.bf16.msra.mxu1 %v235_v4 }
   0x5   :  { %220 = vmatprep.subr.bf16.mxu1 %v263_v1 }
   0x6   :  { %213 = vmatpush3.bf16.msra.mxu0 %v234_v2 }
   0x7   :  { %10 = vsyncpa [#allocation3], 0  ;;  %v237_v7 = vld [vmem:[%s338_s3 + $0x10] sm:$0xff]   ;;  %v238_v8 = vld [vmem:[%s338_s3 + $0x18] sm:$0xff]   ;;  %vm132_vm2 = vcmask 523264   ;;  %s265_s9 = smov [#allocation2]  }
   0x8   :  { %221 = vmatpush3.bf16.msra.mxu1 %v236_v5  ;;  %v192_v9 = vld [vmem:[%s337_s2] ss:$0 sm:$0xff]  ;;  %s184_s3 = sshll.u32 %s265_s9, 4  ;;  %vm176_vm3 = vcmask 64512   ;;  %s185_s3 = int_to_ptr.vmem [resolvable:$true] %s184_s3 }
   0x9   :  { %215 = vmatmul.mubr.msk.bf16.vlgmr.msra.gmra.mrb[0].mxu0 %vm47_vm1, %v23_v6  ;;  %222 = vmatprep.subr.bf16.mxu1 %v263_v1  ;;  %v196_v17 = vld [vmem:[%s339_s4] ss:$0 sm:$0xff]  ;;  %s239_s2 = scalar_lea.vmem %s185_s3, 128  ;;  %p244_p1 = scmp.lt.s32.totalorder %s185_s3, %s185_s3 }
   0xa   :  { %p240_p0 = scmp.ne.s32.totalorder %s185_s3, %s239_s2  ;;  %p245_p2 = scmp.lt.s32.totalorder %s239_s2, %s239_s2 }
   0xc   :  { %223 = vmatpush3.bf16.msra.mxu1 %v237_v7  ;;  %p246_p3 = por %p245_p2, %p244_p1 }
   0xd   :  { %224 = vmatprep.subr.bf16.mxu1 %v263_v1 }
   0xe   :  { %p247_p4 = pnand %p246_p3, %p240_p0 }
  0x10   :  { %225 = vmatpush3.bf16.msra.mxu1 %v238_v8 }
  0xdc   :  { %v85_v10 = vpop.f32.mrb[0].mxu0 }
  0xdd   :  { %v86_v11 = vadd.f32 %v192_v9, %v85_v10  ;;  %v216_v12 = vpop.f32.mrb[1].mxu0 }
  0xde   :  { %v88_v13 = vpop.f32.mrb[2].mxu0 }
  0xdf   :  { %v91_v14 = vmax.f32 %v86_v11, 0.0  ;;  %v217_v15 = vpop.f32.mrb[3].mxu0 }
  0xe1   :  { %v92_v16 = vpack.c.bf16 %v91_v14, %v91_v14 }
  0xe3   :  { %227 = vmatmul.mubr.msk.bf16.vlgmr.msra.gmra.mrb[0].mxu1 %vm132_vm2, %v92_v16 }
 0x1b6   :  { %v170_v18 = vpop.f32.mrb[0].mxu1 }
 0x1b7   :  { %v171_v19 = vadd.f32 %v196_v17, %v170_v18  ;;  %v228_v20 = vpop.f32.mrb[1].mxu1 }
 0x1b8   :  { %v173_v21 = vpop.f32.mrb[2].mxu1 }
 0x1b9   :  { %v229_v22 = vpop.f32.mrb[3].mxu1  ;;  %177 = vst.msk [vmem:[#allocation2] sm:$0xff] %vm176_vm3, %v171_v19 }
 0x1ba   :  { %250 = shalt.err (!%p247_p4)
}
 0x1bb   :  { %s251_s4 = scalar_lea.hbm %s340_s5, 128 }
 0x1bc   :  { %p252_p5 = scmp.ne.s32.totalorder %s340_s5, %s251_s4  ;;  %p255_p6 = scmp.lt.u32.totalorder %s251_s4, %s340_s5 }
 0x1be   :  { %p257_p7 = pnand %p255_p6, %p252_p5 }
 0x1c0   :  { %260 = shalt.err (!%p257_p7)
}
 0x1c1   :  { %187 = dma.vmem_to_hbm [thread:$0]  %s185_s3, 128, %s340_s5, [#allocation3]  }
 0x1c2   :  { %261 = dma.done.wait [#allocation3], 128  }
 0x1c3   :  { %262 = vsyncadd [#allocation3], 4294967168 }
 0x1c4   :  { %191 = vsyncpa [#allocation3], 1 }

</bundles_post_ra>
